<compile_context>
chip_gen: v6e
topology: v6e:2x2x1
jax: 0.10.0
libtpu: 0.0.40
codegen_flags: <defaults>
</compile_context>

<pallas_src>
import math

import jax
import jax.numpy as jnp
from jax.experimental import pallas as pl
from jax.experimental.pallas import tpu as pltpu

HIDDEN = 400


def _actor_kernel(x_ref, w1_ref, b1_ref, w2_ref, b2_ref, w3_ref, b3_ref, o_ref):
    # Layer 1: (tb, obs_dim_p) @ (obs_dim_p, Hp) -> f32 acc, bias + ReLU in f32.
    h = jnp.dot(x_ref[...], w1_ref[...], preferred_element_type=jnp.float32)
    h = jnp.maximum(h + b1_ref[...], 0.0)
    # Layer 2: cast activations to bf16 right before the dot (MXU), keep f32 elementwise.
    h = jnp.dot(h.astype(jnp.bfloat16), w2_ref[...], preferred_element_type=jnp.float32)
    h = jnp.maximum(h + b2_ref[...], 0.0)
    # Layer 3 (output head, no activation inside the MLP).
    y = jnp.dot(h.astype(jnp.bfloat16), w3_ref[...], preferred_element_type=jnp.float32)
    y = y + b3_ref[...]
    # Actor forward: tanh(net(obs)), computed in f32 on the EUP.
    o_ref[...] = jnp.tanh(y).astype(o_ref.dtype)


def _round_up(x, m):
    return ((x + m - 1) // m) * m


def _pad2(x, rows, cols, dtype):
    r, c = x.shape
    return jnp.pad(x, ((0, rows - r), (0, cols - c))).astype(dtype)


def deterministic_vector_actor(obs, params, *, tile_b=256):
    """obs: (B, obs_dim) float32. params: dict of w1,b1,w2,b2,w3,b3 (f32, (in,out) layout).

    tile_b: max batch tile (256 for v6e/v7x, 128 recommended for v5e). The actual tile is
    min(tile_b, round_up(B, 8)); the batch is zero-padded to a multiple of the tile.
    """
    B, obs_dim = obs.shape
    hidden = params["w1"].shape[1]
    act_dim = params["w3"].shape[1]

    # Pad feature dims to multiples of 128 for clean (8,128) vreg / MXU tiles and a
    # lane-dense output store. Zero padding preserves the valid results exactly.
    obs_dim_p = _round_up(obs_dim, 128)
    hid_p = _round_up(hidden, 128)      # 400 -> 512
    act_dim_p = _round_up(act_dim, 128)

    # Batch tiling: large MXU-friendly tile; pad the batch instead of asserting.
    tb = min(tile_b, _round_up(B, 8))
    B_p = _round_up(B, tb)
    grid = (B_p // tb,)

    # bf16 MXU operands (weights + obs); biases stay f32 for the f32 epilogue.
    obs_p = _pad2(obs, B_p, obs_dim_p, jnp.bfloat16)
    w1 = _pad2(params["w1"], obs_dim_p, hid_p, jnp.bfloat16)
    b1 = _pad2(params["b1"], 1, hid_p, jnp.float32)
    w2 = _pad2(params["w2"], hid_p, hid_p, jnp.bfloat16)
    b2 = _pad2(params["b2"], 1, hid_p, jnp.float32)
    w3 = _pad2(params["w3"], hid_p, act_dim_p, jnp.bfloat16)
    b3 = _pad2(params["b3"], 1, act_dim_p, jnp.float32)

    rep = lambda i: (0, 0)  # weights/biases: full-array block, constant across the grid

    out_p = pl.pallas_call(
        _actor_kernel,
        out_shape=jax.ShapeDtypeStruct((B_p, act_dim_p), jnp.float32),
        grid_spec=pltpu.PrefetchScalarGridSpec(
            num_scalar_prefetch=0,
            grid=grid,
            in_specs=[
                pl.BlockSpec((tb, obs_dim_p), lambda i: (i, 0)),  # obs batch tile
                pl.BlockSpec((obs_dim_p, hid_p), rep),
                pl.BlockSpec((1, hid_p), rep),
                pl.BlockSpec((hid_p, hid_p), rep),
                pl.BlockSpec((1, hid_p), rep),
                pl.BlockSpec((hid_p, act_dim_p), rep),
                pl.BlockSpec((1, act_dim_p), rep),
            ],
            out_specs=pl.BlockSpec((tb, act_dim_p), lambda i: (i, 0)),
        ),
        compiler_params=pltpu.CompilerParams(
            # Batch grid is embarrassingly parallel -> shards across v7x's 2 TensorCores.
            dimension_semantics=("parallel",),
        ),
    )(obs_p, w1, b1, w2, b2, w3, b3)

    # Strip batch / lane padding.
    return out_p[:B, :act_dim]


def init_params(key, obs_dim, act_dim, hidden=HIDDEN):
    """Deterministic init mimicking torch.nn.Linear default (U(-1/sqrt(fan_in), +))."""
    keys = jax.random.split(key, 6)

    def linear(kw, kb, fan_in, fan_out):
        bound = 1.0 / math.sqrt(fan_in)
        w = jax.random.uniform(kw, (fan_in, fan_out), jnp.float32, -bound, bound)
        b = jax.random.uniform(kb, (1, fan_out), jnp.float32, -bound, bound)
        return w, b

    w1, b1 = linear(keys[0], keys[1], obs_dim, hidden)
    w2, b2 = linear(keys[2], keys[3], hidden, hidden)
    w3, b3 = linear(keys[4], keys[5], hidden, act_dim)
    return {"w1": w1, "b1": b1, "w2": w2, "b2": b2, "w3": w3, "b3": b3}


def _reference(obs, p):
    h = jnp.maximum(obs @ p["w1"] + p["b1"], 0.0)
    h = jnp.maximum(h @ p["w2"] + p["b2"], 0.0)
    return jnp.tanh(h @ p["w3"] + p["b3"])


if __name__ == "__main__":
    obs_dim = 32
    act_dim = 8
    batch = 16

    key = jax.random.PRNGKey(0)
    k_obs, k_param = jax.random.split(key)
    obs = jax.random.normal(k_obs, (batch, obs_dim), jnp.float32)
    params = init_params(k_param, obs_dim, act_dim)

    out = deterministic_vector_actor(obs, params)
    out = jax.block_until_ready(out)

    ref = _reference(obs, params)  # f32 reference
    assert out.shape == (batch, act_dim)
    # bf16 MXU operands (f32 accumulation) -> relaxed tolerance vs the f32 reference.
    assert jnp.allclose(out, ref, atol=2e-2, rtol=2e-2), "mismatch vs pure-JAX reference"

    print("KERNEL_OK")
</pallas_src>

<mosaic_0001>
module attributes {stable_mosaic.version = 11 : i64} {
  func.func @_actor_kernel(%arg0: i32, %arg1: memref<16x128xbf16, #tpu.memory_space<vmem>>, %arg2: memref<128x512xbf16, #tpu.memory_space<vmem>>, %arg3: memref<1x512xf32, #tpu.memory_space<vmem>>, %arg4: memref<512x512xbf16, #tpu.memory_space<vmem>>, %arg5: memref<1x512xf32, #tpu.memory_space<vmem>>, %arg6: memref<512x128xbf16, #tpu.memory_space<vmem>>, %arg7: memref<1x128xf32, #tpu.memory_space<vmem>>, %arg8: memref<16x128xf32, #tpu.memory_space<vmem>>) attributes {dimension_semantics = [#tpu.dimension_semantics<parallel>], iteration_bounds = array<i64: 1>, scalar_prefetch = 0 : i64, scratch_operands = 0 : i64, tpu.core_type = #tpu.core_type<tc>, window_params = [{transform_indices = @transform_0, window_bounds = array<i64: 16, 128>}, {pipeline_mode = #tpu.pipeline_mode<synchronous>, transform_indices = @transform_1, window_bounds = array<i64: 128, 512>}, {pipeline_mode = #tpu.pipeline_mode<synchronous>, transform_indices = @transform_2, window_bounds = array<i64: 1, 512>}, {pipeline_mode = #tpu.pipeline_mode<synchronous>, transform_indices = @transform_3, window_bounds = array<i64: 512, 512>}, {pipeline_mode = #tpu.pipeline_mode<synchronous>, transform_indices = @transform_4, window_bounds = array<i64: 1, 512>}, {pipeline_mode = #tpu.pipeline_mode<synchronous>, transform_indices = @transform_5, window_bounds = array<i64: 512, 128>}, {pipeline_mode = #tpu.pipeline_mode<synchronous>, transform_indices = @transform_6, window_bounds = array<i64: 1, 128>}, {transform_indices = @transform_7, window_bounds = array<i64: 16, 128>}]} {
    %c0 = arith.constant 0 : index
    %c0_0 = arith.constant 0 : index
    %0 = vector.load %arg1[%c0, %c0_0] : memref<16x128xbf16, #tpu.memory_space<vmem>>, vector<16x128xbf16>
    %c0_1 = arith.constant 0 : index
    %c0_2 = arith.constant 0 : index
    %1 = vector.load %arg2[%c0_1, %c0_2] : memref<128x512xbf16, #tpu.memory_space<vmem>>, vector<128x512xbf16>
    %cst = arith.constant dense<0.000000e+00> : vector<16x512xf32>
    %2 = tpu.matmul %0, %1, %cst {dimension_numbers = #tpu.dot_dimension_numbers<[1], [0], [0], [1], [0, 0, 1, 1], [], []>} : vector<16x128xbf16>, vector<128x512xbf16>, vector<16x512xf32> -> vector<16x512xf32>
    %c0_3 = arith.constant 0 : index
    %c0_4 = arith.constant 0 : index
    %3 = vector.load %arg3[%c0_3, %c0_4] : memref<1x512xf32, #tpu.memory_space<vmem>>, vector<1x512xf32>
    %4 = vector.broadcast %3 : vector<1x512xf32> to vector<16x512xf32>
    %5 = arith.addf %2, %4 : vector<16x512xf32>
    %cst_5 = arith.constant 0.000000e+00 : f32
    %6 = vector.broadcast %cst_5 : f32 to vector<16x512xf32>
    %7 = arith.maximumf %5, %6 : vector<16x512xf32>
    %8 = arith.truncf %7 : vector<16x512xf32> to vector<16x512xbf16>
    %c0_6 = arith.constant 0 : index
    %c0_7 = arith.constant 0 : index
    %9 = vector.load %arg4[%c0_6, %c0_7] : memref<512x512xbf16, #tpu.memory_space<vmem>>, vector<512x512xbf16>
    %cst_8 = arith.constant dense<0.000000e+00> : vector<16x512xf32>
    %10 = tpu.matmul %8, %9, %cst_8 {dimension_numbers = #tpu.dot_dimension_numbers<[1], [0], [0], [1], [0, 0, 1, 1], [], []>} : vector<16x512xbf16>, vector<512x512xbf16>, vector<16x512xf32> -> vector<16x512xf32>
    %c0_9 = arith.constant 0 : index
    %c0_10 = arith.constant 0 : index
    %11 = vector.load %arg5[%c0_9, %c0_10] : memref<1x512xf32, #tpu.memory_space<vmem>>, vector<1x512xf32>
    %12 = vector.broadcast %11 : vector<1x512xf32> to vector<16x512xf32>
    %13 = arith.addf %10, %12 : vector<16x512xf32>
    %cst_11 = arith.constant 0.000000e+00 : f32
    %14 = vector.broadcast %cst_11 : f32 to vector<16x512xf32>
    %15 = arith.maximumf %13, %14 : vector<16x512xf32>
    %16 = arith.truncf %15 : vector<16x512xf32> to vector<16x512xbf16>
    %c0_12 = arith.constant 0 : index
    %c0_13 = arith.constant 0 : index
    %17 = vector.load %arg6[%c0_12, %c0_13] : memref<512x128xbf16, #tpu.memory_space<vmem>>, vector<512x128xbf16>
    %cst_14 = arith.constant dense<0.000000e+00> : vector<16x128xf32>
    %18 = tpu.matmul %16, %17, %cst_14 {dimension_numbers = #tpu.dot_dimension_numbers<[1], [0], [0], [1], [0, 0, 1, 1], [], []>} : vector<16x512xbf16>, vector<512x128xbf16>, vector<16x128xf32> -> vector<16x128xf32>
    %c0_15 = arith.constant 0 : index
    %c0_16 = arith.constant 0 : index
    %19 = vector.load %arg7[%c0_15, %c0_16] : memref<1x128xf32, #tpu.memory_space<vmem>>, vector<1x128xf32>
    %20 = vector.broadcast %19 : vector<1x128xf32> to vector<16x128xf32>
    %21 = arith.addf %18, %20 : vector<16x128xf32>
    %22 = math.tanh %21 : vector<16x128xf32>
    %c0_17 = arith.constant 0 : index
    %c0_18 = arith.constant 0 : index
    %23 = vector.load %arg8[%c0_17, %c0_18] : memref<16x128xf32, #tpu.memory_space<vmem>>, vector<16x128xf32>
    tpu.vector_store %arg8[%c0_17, %c0_18], %22 {strides = array<i32>} : memref<16x128xf32, #tpu.memory_space<vmem>>, vector<16x128xf32>,
    return
  }
  func.func @transform_0(%arg0: i32) -> (i32, i32) {
    %c0_i32 = arith.constant 0 : i32
    %c0_i32_0 = arith.constant 0 : i32
    return %arg0, %c0_i32 : i32, i32
  }
  func.func @transform_1(%arg0: i32) -> (i32, i32) {
    %c0_i32 = arith.constant 0 : i32
    %c0_i32_0 = arith.constant 0 : i32
    %c0_i32_1 = arith.constant 0 : i32
    return %c0_i32, %c0_i32_0 : i32, i32
  }
  func.func @transform_2(%arg0: i32) -> (i32, i32) {
    %c0_i32 = arith.constant 0 : i32
    %c0_i32_0 = arith.constant 0 : i32
    %c0_i32_1 = arith.constant 0 : i32
    return %c0_i32, %c0_i32_0 : i32, i32
  }
  func.func @transform_3(%arg0: i32) -> (i32, i32) {
    %c0_i32 = arith.constant 0 : i32
    %c0_i32_0 = arith.constant 0 : i32
    %c0_i32_1 = arith.constant 0 : i32
    return %c0_i32, %c0_i32_0 : i32, i32
  }
  func.func @transform_4(%arg0: i32) -> (i32, i32) {
    %c0_i32 = arith.constant 0 : i32
    %c0_i32_0 = arith.constant 0 : i32
    %c0_i32_1 = arith.constant 0 : i32
    return %c0_i32, %c0_i32_0 : i32, i32
  }
  func.func @transform_5(%arg0: i32) -> (i32, i32) {
    %c0_i32 = arith.constant 0 : i32
    %c0_i32_0 = arith.constant 0 : i32
    %c0_i32_1 = arith.constant 0 : i32
    return %c0_i32, %c0_i32_0 : i32, i32
  }
  func.func @transform_6(%arg0: i32) -> (i32, i32) {
    %c0_i32 = arith.constant 0 : i32
    %c0_i32_0 = arith.constant 0 : i32
    %c0_i32_1 = arith.constant 0 : i32
    return %c0_i32, %c0_i32_0 : i32, i32
  }
  func.func @transform_7(%arg0: i32) -> (i32, i32) {
    %c0_i32 = arith.constant 0 : i32
    %c0_i32_0 = arith.constant 0 : i32
    return %arg0, %c0_i32 : i32, i32
  }
}

</mosaic_0001>

<bundles_post_ra>
// kernel: tpu_custom_call.1
= control target key start
LH: loop header
LB: loop body
LE: loop exit
PB: predicated region body
PF: predicated region fallthrough
CT: control target
= control target key end

     0   :  { %12 = vsyncpa [#allocation3], 0  ;;  %s2519_s0 = inlined_call_operand.hbm [shape: bf16[16,128], index: 0, kind: input, shape index: {}]   ;;  %s2520_s1 = inlined_call_operand.hbm [shape: bf16[128,512], index: 1, kind: input, shape index: {}]   ;;  %s2521_s2 = inlined_call_operand.hbm [shape: f32[1,512], index: 2, kind: input, shape index: {}]   ;;  %s2522_s3 = inlined_call_operand.hbm [shape: bf16[512,512], index: 3, kind: input, shape index: {}]   ;;  %s2523_s4 = inlined_call_operand.vmem [shape: f32[1,512], index: 4, kind: input, shape index: {}]   ;;  %s2524_s5 = inlined_call_operand.hbm [shape: bf16[512,128], index: 5, kind: input, shape index: {}]   ;;  %s2525_s6 = inlined_call_operand.vmem [shape: f32[1,128], index: 6, kind: input, shape index: {}]   ;;  %s2526_s7 = inlined_call_operand.hbm [shape: f32[16,128], index: 7, kind: output, shape index: {}]  }
   0x1   :  { %13 = vsyncpa [#allocation6], 0 }
   0x2   :  { %14 = vsyncpa [#allocation9], 0 }
   0x3   :  { %15 = vsyncpa [#allocation4], 0  ;;  %s2412_s24 = smov [#allocation5]  }
   0x4   :  { %s33_s25 = sshll.u32 %s2412_s24, 4  ;;  %s34_s25 = int_to_ptr.vmem [resolvable:$true] %s33_s25 }
   0x5   :  { %s2292_s26 = scalar_lea.vmem %s34_s25, 4096  ;;  %p2297_p1 = scmp.lt.s32.totalorder %s34_s25, %s34_s25 }
   0x6   :  { %p2293_p0 = scmp.ne.s32.totalorder %s34_s25, %s2292_s26  ;;  %p2298_p2 = scmp.lt.s32.totalorder %s2292_s26, %s2292_s26 }
   0x8   :  { %p2299_p3 = por %p2298_p2, %p2297_p1 }
   0xa   :  { %p2300_p4 = pnand %p2299_p3, %p2293_p0 }
   0xc   :  { %2303 = shalt.err (!%p2300_p4)
}
   0xd   :  { %s2413_s27 = smov 256   ;;  %s2414_s28 = smov 16  }
   0xe   :  { %39 = dma.hbm_to_vmem [thread:$0]  %s2520_s1, 4096, %s34_s25, [#allocation6], %s2413_s27, %s2413_s27, %s2414_s28  }
   0xf   :  { %s2415_s8 = smov [#allocation8]   ;;  %s2416_s10 = smov [#allocation2]  }
  0x10   :  { %s55_s9 = sshll.u32 %s2415_s8, 4  ;;  %s21_s11 = sshll.u32 %s2416_s10, 4  ;;  %s56_s9 = int_to_ptr.vmem [resolvable:$true] %s55_s9  ;;  %s22_s11 = int_to_ptr.vmem [resolvable:$true] %s21_s11 }
  0x11   :  { %s2312_s12 = scalar_lea.vmem %s56_s9, 16384  ;;  %p2317_p6 = scmp.lt.s32.totalorder %s56_s9, %s56_s9 }
  0x12   :  { %p2313_p5 = scmp.ne.s32.totalorder %s56_s9, %s2312_s12  ;;  %p2318_p7 = scmp.lt.s32.totalorder %s2312_s12, %s2312_s12 }
  0x14   :  { %p2319_p8 = por %p2318_p7, %p2317_p6 }
  0x16   :  { %p2320_p9 = pnand %p2319_p8, %p2313_p5 }
  0x18   :  { %2323 = shalt.err (!%p2320_p9)
}
  0x19   :  { %61 = dma.hbm_to_vmem [thread:$0]  %s2522_s3, 16384, %s56_s9, [#allocation9], %s2413_s27, %s2413_s27, %s2414_s28  }
  0x1a   :  { %s2332_s15 = scalar_lea.vmem %s22_s11, 128  ;;  %p2337_p11 = scmp.lt.s32.totalorder %s22_s11, %s22_s11 }
  0x1b   :  { %p2333_p10 = scmp.ne.s32.totalorder %s22_s11, %s2332_s15  ;;  %p2338_p12 = scmp.lt.s32.totalorder %s2332_s15, %s2332_s15 }
  0x1d   :  { %p2339_p13 = por %p2338_p12, %p2337_p11 }
  0x1f   :  { %p2340_p0 = pnand %p2339_p13, %p2333_p10 }
  0x21   :  { %2343 = shalt.err (!%p2340_p0)
}
  0x22   :  { %s2417_s1 = smov 64   ;;  %s2418_s16 = smov 4  }
  0x23   :  { %27 = dma.hbm_to_vmem [thread:$0]  %s2519_s0, 128, %s22_s11, [#allocation3], %s2417_s1, %s2417_s1, %s2418_s16  }
  0x24   :  { %s2419_s19 = smov [#allocation7]   ;;  %s2420_s21 = smov [#allocation10]  }
  0x25   :  { %s46_s20 = sshll.u32 %s2419_s19, 4  ;;  %s69_s22 = sshll.u32 %s2420_s21, 4  ;;  %s47_s20 = int_to_ptr.vmem [resolvable:$true] %s46_s20  ;;  %s70_s22 = int_to_ptr.vmem [resolvable:$true] %s69_s22 }
  0x26   :  { %s2352_s3 = scalar_lea.vmem %s47_s20, 64  ;;  %p2357_p2 = scmp.lt.s32.totalorder %s47_s20, %s47_s20 }
  0x27   :  { %p2353_p1 = scmp.ne.s32.totalorder %s47_s20, %s2352_s3  ;;  %p2358_p3 = scmp.lt.s32.totalorder %s2352_s3, %s2352_s3 }
  0x29   :  { %p2359_p4 = por %p2358_p3, %p2357_p2 }
  0x2b   :  { %p2360_p5 = pnand %p2359_p4, %p2353_p1 }
  0x2d   :  { %2363 = shalt.err (!%p2360_p5)
}
  0x2e   :  { %49 = dma.hbm_to_vmem [thread:$0]  %s2521_s2, 64, %s47_s20, [#allocation6]  }
  0x2f   :  { %s2372_s25 = scalar_lea.vmem %s70_s22, 4096  ;;  %p2377_p7 = scmp.lt.s32.totalorder %s70_s22, %s70_s22 }
  0x30   :  { %p2373_p6 = scmp.ne.s32.totalorder %s70_s22, %s2372_s25  ;;  %p2378_p8 = scmp.lt.s32.totalorder %s2372_s25, %s2372_s25 }
  0x32   :  { %p2379_p9 = por %p2378_p8, %p2377_p7 }
  0x34   :  { %p2380_p10 = pnand %p2379_p9, %p2373_p6 }
  0x36   :  { %2383 = shalt.err (!%p2380_p10)
}
  0x37   :  { %75 = dma.hbm_to_vmem [thread:$0]  %s2524_s5, 4096, %s70_s22, [#allocation9], %s2417_s1, %s2417_s1, %s2418_s16  }
  0x38   :  { %2404 = dma.done.wait [#allocation3], 128  }
  0x39   :  { %2405 = vsyncadd [#allocation3], 4294967168 }
  0x3a   :  { %2406 = dma.done.wait [#allocation6], 4160  }
  0x3b   :  { %2407 = vsyncadd [#allocation6], 4294963136 }
  0x3c   :  { %2408 = dma.done.wait [#allocation9], 20480  }
  0x3d   :  { %2409 = vsyncadd [#allocation9], 4294946816  ;;  %v2421_v0 = vmov 0   ;;  %v2007_v1 = vld [vmem:[#allocation5 + $0xe4] ss:$16 sps:$4 sm:$0xff]   ;;  %v2055_v35 = vld [vmem:[#allocation2] sm:$0xff]  }
  0x3e   :  { %348 = vmatprep.mubr.bf16.mxu0 %v2421_v0  ;;  %391 = vmatprep.mubr.bf16.mxu1 %v2421_v0  ;;  %v2009_v2 = vld [vmem:[#allocation5 + $0xec] ss:$16 sps:$4 sm:$0xff]   ;;  %v2011_v3 = vld [vmem:[#allocation5 + $0xe0] ss:$16 sps:$4 sm:$0xff]   ;;  %v2012_v4 = vld [vmem:[#allocation5 + $0xe8] ss:$16 sps:$4 sm:$0xff]  }
  0x3f   :  { %316 = vmatprep.subr.bf16.mxu0 %v2007_v1  ;;  %359 = vmatprep.subr.bf16.mxu1 %v2009_v2  ;;  %v2013_v5 = vld [vmem:[#allocation5 + $0xc4] ss:$16 sps:$4 sm:$0xff]   ;;  %v2015_v6 = vld [vmem:[#allocation5 + $0xcc] ss:$16 sps:$4 sm:$0xff]   ;;  %v2017_v7 = vld [vmem:[#allocation5 + $0xc0] ss:$16 sps:$4 sm:$0xff]  }
  0x40   :  { %317 = vmatpush1.bf16.msra.mxu0 %v2011_v3  ;;  %360 = vmatpush1.bf16.msra.mxu1 %v2012_v4  ;;  %v2018_v8 = vld [vmem:[#allocation5 + $0xc8] ss:$16 sps:$4 sm:$0xff]   ;;  %v2019_v9 = vld [vmem:[#allocation5 + $0xa4] ss:$16 sps:$4 sm:$0xff]   ;;  %v2021_v10 = vld [vmem:[#allocation5 + $0xac] ss:$16 sps:$4 sm:$0xff]  }
  0x41   :  { %318 = vmatprep.subr.bf16.mxu0 %v2013_v5  ;;  %361 = vmatprep.subr.bf16.mxu1 %v2015_v6  ;;  %v2023_v11 = vld [vmem:[#allocation5 + $0xa0] ss:$16 sps:$4 sm:$0xff]   ;;  %v2024_v12 = vld [vmem:[#allocation5 + $0xa8] ss:$16 sps:$4 sm:$0xff]   ;;  %v2025_v13 = vld [vmem:[#allocation5 + $0x84] ss:$16 sps:$4 sm:$0xff]  }
  0x42   :  { %v2027_v14 = vld [vmem:[#allocation5 + $0x8c] ss:$16 sps:$4 sm:$0xff]   ;;  %v2029_v15 = vld [vmem:[#allocation5 + $0x80] ss:$16 sps:$4 sm:$0xff]   ;;  %v2030_v16 = vld [vmem:[#allocation5 + $0x88] ss:$16 sps:$4 sm:$0xff]  }
  0x43   :  { %v2031_v17 = vld [vmem:[#allocation5 + $0x64] ss:$16 sps:$4 sm:$0xff]   ;;  %v2033_v18 = vld [vmem:[#allocation5 + $0x6c] ss:$16 sps:$4 sm:$0xff]   ;;  %v2035_v19 = vld [vmem:[#allocation5 + $0x60] ss:$16 sps:$4 sm:$0xff]  }
  0x44   :  { %319 = vmatpush1.bf16.msra.mxu0 %v2017_v7  ;;  %362 = vmatpush1.bf16.msra.mxu1 %v2018_v8  ;;  %v2036_v20 = vld [vmem:[#allocation5 + $0x68] ss:$16 sps:$4 sm:$0xff]   ;;  %v2037_v21 = vld [vmem:[#allocation5 + $0x44] ss:$16 sps:$4 sm:$0xff]   ;;  %v2039_v22 = vld [vmem:[#allocation5 + $0x4c] ss:$16 sps:$4 sm:$0xff]  }
  0x45   :  { %320 = vmatprep.subr.bf16.mxu0 %v2019_v9  ;;  %363 = vmatprep.subr.bf16.mxu1 %v2021_v10  ;;  %v2041_v23 = vld [vmem:[#allocation5 + $0x40] ss:$16 sps:$4 sm:$0xff]   ;;  %v2042_v24 = vld [vmem:[#allocation5 + $0x48] ss:$16 sps:$4 sm:$0xff]   ;;  %v2043_v25 = vld [vmem:[#allocation5 + $0x24] ss:$16 sps:$4 sm:$0xff]  }
  0x46   :  { %v2045_v26 = vld [vmem:[#allocation5 + $0x2c] ss:$16 sps:$4 sm:$0xff]   ;;  %v2047_v27 = vld [vmem:[#allocation5 + $0x20] ss:$16 sps:$4 sm:$0xff]   ;;  %v2048_v28 = vld [vmem:[#allocation5 + $0x28] ss:$16 sps:$4 sm:$0xff]  }
  0x47   :  { %v2049_v29 = vld [vmem:[#allocation5 + $0x4] ss:$16 sps:$4 sm:$0xff]   ;;  %v2051_v30 = vld [vmem:[#allocation5 + $0xc] ss:$16 sps:$4 sm:$0xff]   ;;  %v2053_v31 = vld [vmem:[#allocation5] ss:$16 sps:$4 sm:$0xff]  }
  0x48   :  { %321 = vmatpush1.bf16.msra.mxu0 %v2023_v11  ;;  %364 = vmatpush1.bf16.msra.mxu1 %v2024_v12  ;;  %v2054_v32 = vld [vmem:[#allocation5 + $0x8] ss:$16 sps:$4 sm:$0xff]   ;;  %v2056_v36 = vld [vmem:[#allocation8 + $0xe0] ss:$16 sps:$4 sm:$0xff]   ;;  %s2422_s28 = smov [#allocation11]  }
  0x49   :  { %322 = vmatprep.subr.bf16.mxu0 %v2025_v13  ;;  %365 = vmatprep.subr.bf16.mxu1 %v2027_v14  ;;  %v2058_v33 = vld [vmem:[#allocation8 + $0xe4] ss:$16 sps:$4 sm:$0xff]   ;;  %v2059_v37 = vld [vmem:[#allocation8 + $0x2e0] ss:$16 sps:$4 sm:$0xff]   ;;  %s1742_s29 = sshll.u32 %s2422_s28, 4  ;;  %s1743_s29 = int_to_ptr.vmem [resolvable:$true] %s1742_s29 }
  0x4a   :  { %v2061_v34 = vld [vmem:[#allocation8 + $0x2e4] ss:$16 sps:$4 sm:$0xff]   ;;  %v2062_v40 = vld [vmem:[#allocation8 + $0xc0] ss:$16 sps:$4 sm:$0xff]   ;;  %p2389_p12 = scmp.lt.s32.totalorder %s1743_s29, %s1743_s29 }
  0x4b   :  { %v2064_v38 = vld [vmem:[#allocation8 + $0xc4] ss:$16 sps:$4 sm:$0xff]   ;;  %v2065_v41 = vld [vmem:[#allocation8 + $0x2c0] ss:$16 sps:$4 sm:$0xff]  }
  0x4c   :  { %323 = vmatpush1.bf16.msra.mxu0 %v2029_v15  ;;  %366 = vmatpush1.bf16.msra.mxu1 %v2030_v16  ;;  %v2067_v39 = vld [vmem:[#allocation8 + $0x2c4] ss:$16 sps:$4 sm:$0xff]   ;;  %v2068_v44 = vld [vmem:[#allocation8 + $0xa0] ss:$16 sps:$4 sm:$0xff]  }
  0x4d   :  { %324 = vmatprep.subr.bf16.mxu0 %v2031_v17  ;;  %367 = vmatprep.subr.bf16.mxu1 %v2033_v18  ;;  %v2070_v42 = vld [vmem:[#allocation8 + $0xa4] ss:$16 sps:$4 sm:$0xff]   ;;  %v2071_v45 = vld [vmem:[#allocation8 + $0x2a0] ss:$16 sps:$4 sm:$0xff]  }
  0x4e   :  { %v2073_v43 = vld [vmem:[#allocation8 + $0x2a4] ss:$16 sps:$4 sm:$0xff]   ;;  %v2074_v48 = vld [vmem:[#allocation8 + $0x80] ss:$16 sps:$4 sm:$0xff]  }
  0x4f   :  { %v2076_v46 = vld [vmem:[#allocation8 + $0x84] ss:$16 sps:$4 sm:$0xff]   ;;  %v2077_v49 = vld [vmem:[#allocation8 + $0x280] ss:$16 sps:$4 sm:$0xff]  }
  0x50   :  { %325 = vmatpush1.bf16.msra.mxu0 %v2035_v19  ;;  %368 = vmatpush1.bf16.msra.mxu1 %v2036_v20  ;;  %v2079_v47 = vld [vmem:[#allocation8 + $0x284] ss:$16 sps:$4 sm:$0xff]   ;;  %v2080_v52 = vld [vmem:[#allocation8 + $0x60] ss:$16 sps:$4 sm:$0xff]  }
  0x51   :  { %326 = vmatprep.subr.bf16.mxu0 %v2037_v21  ;;  %369 = vmatprep.subr.bf16.mxu1 %v2039_v22  ;;  %v2082_v50 = vld [vmem:[#allocation8 + $0x64] ss:$16 sps:$4 sm:$0xff]   ;;  %v2083_v53 = vld [vmem:[#allocation8 + $0x260] ss:$16 sps:$4 sm:$0xff]  }
  0x52   :  { %v2085_v51 = vld [vmem:[#allocation8 + $0x264] ss:$16 sps:$4 sm:$0xff]   ;;  %v2086_v56 = vld [vmem:[#allocation8 + $0x40] ss:$16 sps:$4 sm:$0xff]  }
  0x53   :  { %v2088_v54 = vld [vmem:[#allocation8 + $0x44] ss:$16 sps:$4 sm:$0xff]   ;;  %v2089_v57 = vld [vmem:[#allocation8 + $0x240] ss:$16 sps:$4 sm:$0xff]  }
  0x54   :  { %327 = vmatpush1.bf16.msra.mxu0 %v2041_v23  ;;  %370 = vmatpush1.bf16.msra.mxu1 %v2042_v24  ;;  %v2091_v55 = vld [vmem:[#allocation8 + $0x244] ss:$16 sps:$4 sm:$0xff]   ;;  %v2092_v60 = vld [vmem:[#allocation8 + $0x20] ss:$16 sps:$4 sm:$0xff]  }
  0x55   :  { %328 = vmatprep.subr.bf16.mxu0 %v2043_v25  ;;  %371 = vmatprep.subr.bf16.mxu1 %v2045_v26  ;;  %v2094_v58 = vld [vmem:[#allocation8 + $0x24] ss:$16 sps:$4 sm:$0xff]   ;;  %v2095_v61 = vld [vmem:[#allocation8 + $0x220] ss:$16 sps:$4 sm:$0xff]  }
  0x56   :  { %v2097_v59 = vld [vmem:[#allocation8 + $0x224] ss:$16 sps:$4 sm:$0xff]   ;;  %v2098_v0 = vld [vmem:[#allocation8] ss:$16 sps:$4 sm:$0xff]  }
  0x57   :  { %v2100_v62 = vld [vmem:[#allocation8 + $0x4] ss:$16 sps:$4 sm:$0xff]   ;;  %v2101_v1 = vld [vmem:[#allocation8 + $0x200] ss:$16 sps:$4 sm:$0xff]  }
  0x58   :  { %329 = vmatpush1.bf16.msra.mxu0 %v2047_v27  ;;  %372 = vmatpush1.bf16.msra.mxu1 %v2048_v28  ;;  %v2103_v63 = vld [vmem:[#allocation8 + $0x204] ss:$16 sps:$4 sm:$0xff]   ;;  %v2104_v4 = vld [vmem:[#allocation8 + $0x1e0] ss:$16 sps:$4 sm:$0xff]  }
  0x59   :  { %330 = vmatprep.subr.bf16.mxu0 %v2049_v29  ;;  %373 = vmatprep.subr.bf16.mxu1 %v2051_v30  ;;  %v2106_v2 = vld [vmem:[#allocation8 + $0x1e4] ss:$16 sps:$4 sm:$0xff]   ;;  %v2107_v5 = vld [vmem:[#allocation8 + $0x3e0] ss:$16 sps:$4 sm:$0xff]  }
  0x5a   :  { %v2109_v3 = vld [vmem:[#allocation8 + $0x3e4] ss:$16 sps:$4 sm:$0xff]   ;;  %v2110_v8 = vld [vmem:[#allocation8 + $0x1c0] ss:$16 sps:$4 sm:$0xff]  }
  0x5b   :  { %v2112_v6 = vld [vmem:[#allocation8 + $0x1c4] ss:$16 sps:$4 sm:$0xff]   ;;  %v2113_v9 = vld [vmem:[#allocation8 + $0x3c0] ss:$16 sps:$4 sm:$0xff]  }
  0x5c   :  { %331 = vmatpush1.bf16.msra.mxu0 %v2053_v31  ;;  %374 = vmatpush1.bf16.msra.mxu1 %v2054_v32  ;;  %v2115_v7 = vld [vmem:[#allocation8 + $0x3c4] ss:$16 sps:$4 sm:$0xff]   ;;  %v2116_v12 = vld [vmem:[#allocation8 + $0x1a0] ss:$16 sps:$4 sm:$0xff]  }
  0x5d   :  { %1204 = vmatprep.subr.bf16.mxu0 %v2058_v33  ;;  %1247 = vmatprep.subr.bf16.mxu1 %v2061_v34  ;;  %v2118_v10 = vld [vmem:[#allocation8 + $0x1a4] ss:$16 sps:$4 sm:$0xff]   ;;  %v2119_v13 = vld [vmem:[#allocation8 + $0x3a0] ss:$16 sps:$4 sm:$0xff]   ;;  %v2154_v34 = vld [vmem:[#allocation8 + $0xec] ss:$16 sps:$4 sm:$0xff]  }
  0x5e   :  { %v2121_v11 = vld [vmem:[#allocation8 + $0x3a4] ss:$16 sps:$4 sm:$0xff]   ;;  %v2122_v16 = vld [vmem:[#allocation8 + $0x180] ss:$16 sps:$4 sm:$0xff]  }
  0x5f   :  { %349 = vmatmul.mubr.bf16.vlgmr.msra.gmra.mxu0 %v2055_v35  ;;  %392 = vmatmul.mubr.bf16.vlgmr.msra.gmra.mxu1 %v2055_v35  ;;  %v2124_v14 = vld [vmem:[#allocation8 + $0x184] ss:$16 sps:$4 sm:$0xff]   ;;  %v2125_v17 = vld [vmem:[#allocation8 + $0x380] ss:$16 sps:$4 sm:$0xff]   ;;  %v2157_v35 = vld [vmem:[#allocation8 + $0x2ec] ss:$16 sps:$4 sm:$0xff]  }
  0x60   :  { %1205 = vmatpush1.bf16.msra.mxu0 %v2056_v36  ;;  %1248 = vmatpush1.bf16.msra.mxu1 %v2059_v37  ;;  %v2127_v15 = vld [vmem:[#allocation8 + $0x384] ss:$16 sps:$4 sm:$0xff]   ;;  %v2128_v20 = vld [vmem:[#allocation8 + $0x160] ss:$16 sps:$4 sm:$0xff]   ;;  %v130_v36 = vlaneseq }
  0x61   :  { %1206 = vmatprep.subr.bf16.mxu0 %v2064_v38  ;;  %1249 = vmatprep.subr.bf16.mxu1 %v2067_v39  ;;  %v2130_v18 = vld [vmem:[#allocation8 + $0x164] ss:$16 sps:$4 sm:$0xff]   ;;  %v2131_v21 = vld [vmem:[#allocation8 + $0x360] ss:$16 sps:$4 sm:$0xff]  }
  0x62   :  { %v2133_v19 = vld [vmem:[#allocation8 + $0x364] ss:$16 sps:$4 sm:$0xff]   ;;  %v2134_v24 = vld [vmem:[#allocation8 + $0x140] ss:$16 sps:$4 sm:$0xff]   ;;  %v2480_v37 = vshrl.u32 %v130_v36, 7 }
  0x63   :  { %v2136_v22 = vld [vmem:[#allocation8 + $0x144] ss:$16 sps:$4 sm:$0xff]   ;;  %v2137_v25 = vld [vmem:[#allocation8 + $0x340] ss:$16 sps:$4 sm:$0xff]   ;;  %v2191_v36 = vld [vmem:[#allocation8 + $0x228] ss:$16 sps:$4 sm:$0xff]  }
  0x64   :  { %1207 = vmatpush1.bf16.msra.mxu0 %v2062_v40  ;;  %1250 = vmatpush1.bf16.msra.mxu1 %v2065_v41  ;;  %v2139_v23 = vld [vmem:[#allocation8 + $0x344] ss:$16 sps:$4 sm:$0xff]   ;;  %v2140_v28 = vld [vmem:[#allocation8 + $0x120] ss:$16 sps:$4 sm:$0xff]   ;;  %v136_v38 = vsub.s32 1, %v2480_v37  ;;  %v144_v39 = vsub.s32 3, %v2480_v37 }
  0x65   :  { %1208 = vmatprep.subr.bf16.mxu0 %v2070_v42  ;;  %1251 = vmatprep.subr.bf16.mxu1 %v2073_v43  ;;  %v2142_v26 = vld [vmem:[#allocation8 + $0x124] ss:$16 sps:$4 sm:$0xff]   ;;  %v2143_v29 = vld [vmem:[#allocation8 + $0x320] ss:$16 sps:$4 sm:$0xff]   ;;  %v132_v40 = vsub.s32 0, %v2480_v37  ;;  %v140_v41 = vsub.s32 2, %v2480_v37 }
  0x66   :  { %v2145_v27 = vld [vmem:[#allocation8 + $0x324] ss:$16 sps:$4 sm:$0xff]   ;;  %v2146_v32 = vld [vmem:[#allocation8 + $0x100] ss:$16 sps:$4 sm:$0xff]   ;;  %v128_v42 = vld [vmem:[#allocation7] sm:$0xf] }
  0x67   :  { %v2148_v30 = vld [vmem:[#allocation8 + $0x104] ss:$16 sps:$4 sm:$0xff]   ;;  %v2149_v33 = vld [vmem:[#allocation8 + $0x300] ss:$16 sps:$4 sm:$0xff]  }
  0x68   :  { %1209 = vmatpush1.bf16.msra.mxu0 %v2068_v44  ;;  %1252 = vmatpush1.bf16.msra.mxu1 %v2071_v45  ;;  %v2151_v31 = vld [vmem:[#allocation8 + $0x304] ss:$16 sps:$4 sm:$0xff]   ;;  %v137_v45 = vrot.slane %v128_v42, %v136_v38 }
  0x69   :  { %1210 = vmatprep.subr.bf16.mxu0 %v2076_v46  ;;  %1253 = vmatprep.subr.bf16.mxu1 %v2079_v47  ;;  %v145_v46 = vrot.slane %v128_v42, %v144_v39  ;;  %v133_v47 = vrot.slane %v128_v42, %v132_v40 }
  0x6c   :  { %1211 = vmatpush1.bf16.msra.mxu0 %v2074_v48  ;;  %1254 = vmatpush1.bf16.msra.mxu1 %v2077_v49  ;;  %v141_v48 = vrot.slane %v128_v42, %v140_v41  ;;  %v2196_v42 = vld [vmem:[#allocation8 + $0xc] ss:$16 sps:$4 sm:$0xff]  }
  0x6d   :  { %1212 = vmatprep.subr.bf16.mxu0 %v2082_v50  ;;  %1255 = vmatprep.subr.bf16.mxu1 %v2085_v51 }
  0x70   :  { %1213 = vmatpush1.bf16.msra.mxu0 %v2080_v52  ;;  %1256 = vmatpush1.bf16.msra.mxu1 %v2083_v53 }
  0x71   :  { %1214 = vmatprep.subr.bf16.mxu0 %v2088_v54  ;;  %1257 = vmatprep.subr.bf16.mxu1 %v2091_v55 }
  0x74   :  { %1215 = vmatpush1.bf16.msra.mxu0 %v2086_v56  ;;  %1258 = vmatpush1.bf16.msra.mxu1 %v2089_v57 }
  0x75   :  { %1216 = vmatprep.subr.bf16.mxu0 %v2094_v58  ;;  %1259 = vmatprep.subr.bf16.mxu1 %v2097_v59 }
  0x78   :  { %1217 = vmatpush1.bf16.msra.mxu0 %v2092_v60  ;;  %1260 = vmatpush1.bf16.msra.mxu1 %v2095_v61 }
  0x79   :  { %1218 = vmatprep.subr.bf16.mxu0 %v2100_v62  ;;  %1261 = vmatprep.subr.bf16.mxu1 %v2103_v63 }
  0x7c   :  { %1219 = vmatpush1.bf16.msra.mxu0 %v2098_v0  ;;  %1262 = vmatpush1.bf16.msra.mxu1 %v2101_v1 }
  0x7d   :  { %1220 = vmatprep.subr.bf16.mxu0 %v2106_v2  ;;  %1263 = vmatprep.subr.bf16.mxu1 %v2109_v3 }
  0x80   :  { %1221 = vmatpush2.bf16.msra.mxu0 %v2104_v4  ;;  %1264 = vmatpush2.bf16.msra.mxu1 %v2107_v5 }
  0x81   :  { %1222 = vmatprep.subr.bf16.mxu0 %v2112_v6  ;;  %1265 = vmatprep.subr.bf16.mxu1 %v2115_v7 }
  0x84   :  { %1223 = vmatpush2.bf16.msra.mxu0 %v2110_v8  ;;  %1266 = vmatpush2.bf16.msra.mxu1 %v2113_v9  ;;  %v2152_v9 = vld [vmem:[#allocation8 + $0xe8] ss:$16 sps:$4 sm:$0xff]  }
  0x85   :  { %1224 = vmatprep.subr.bf16.mxu0 %v2118_v10  ;;  %1267 = vmatprep.subr.bf16.mxu1 %v2121_v11  ;;  %v2155_v10 = vld [vmem:[#allocation8 + $0x2e8] ss:$16 sps:$4 sm:$0xff]  }
  0x88   :  { %1225 = vmatpush2.bf16.msra.mxu0 %v2116_v12  ;;  %1268 = vmatpush2.bf16.msra.mxu1 %v2119_v13  ;;  %v2160_v13 = vld [vmem:[#allocation8 + $0xcc] ss:$16 sps:$4 sm:$0xff]  }
  0x89   :  { %1226 = vmatprep.subr.bf16.mxu0 %v2124_v14  ;;  %1269 = vmatprep.subr.bf16.mxu1 %v2127_v15  ;;  %v2163_v14 = vld [vmem:[#allocation8 + $0x2cc] ss:$16 sps:$4 sm:$0xff]   ;;  %v2158_v15 = vld [vmem:[#allocation8 + $0xc8] ss:$16 sps:$4 sm:$0xff]  }
  0x8c   :  { %1227 = vmatpush2.bf16.msra.mxu0 %v2122_v16  ;;  %1270 = vmatpush2.bf16.msra.mxu1 %v2125_v17  ;;  %v2161_v16 = vld [vmem:[#allocation8 + $0x2c8] ss:$16 sps:$4 sm:$0xff]   ;;  %v2166_v17 = vld [vmem:[#allocation8 + $0xac] ss:$16 sps:$4 sm:$0xff]  }
  0x8d   :  { %1228 = vmatprep.subr.bf16.mxu0 %v2130_v18  ;;  %1271 = vmatprep.subr.bf16.mxu1 %v2133_v19  ;;  %v2169_v18 = vld [vmem:[#allocation8 + $0x2ac] ss:$16 sps:$4 sm:$0xff]   ;;  %v2164_v19 = vld [vmem:[#allocation8 + $0xa8] ss:$16 sps:$4 sm:$0xff]  }
  0x90   :  { %1229 = vmatpush2.bf16.msra.mxu0 %v2128_v20  ;;  %1272 = vmatpush2.bf16.msra.mxu1 %v2131_v21  ;;  %v2167_v20 = vld [vmem:[#allocation8 + $0x2a8] ss:$16 sps:$4 sm:$0xff]   ;;  %v2172_v21 = vld [vmem:[#allocation8 + $0x8c] ss:$16 sps:$4 sm:$0xff]  }
  0x91   :  { %1230 = vmatprep.subr.bf16.mxu0 %v2136_v22  ;;  %1273 = vmatprep.subr.bf16.mxu1 %v2139_v23  ;;  %v2175_v22 = vld [vmem:[#allocation8 + $0x28c] ss:$16 sps:$4 sm:$0xff]   ;;  %v2170_v23 = vld [vmem:[#allocation8 + $0x88] ss:$16 sps:$4 sm:$0xff]  }
  0x94   :  { %1231 = vmatpush2.bf16.msra.mxu0 %v2134_v24  ;;  %1274 = vmatpush2.bf16.msra.mxu1 %v2137_v25  ;;  %v2173_v24 = vld [vmem:[#allocation8 + $0x288] ss:$16 sps:$4 sm:$0xff]   ;;  %v2178_v25 = vld [vmem:[#allocation8 + $0x6c] ss:$16 sps:$4 sm:$0xff]  }
  0x95   :  { %1232 = vmatprep.subr.bf16.mxu0 %v2142_v26  ;;  %1275 = vmatprep.subr.bf16.mxu1 %v2145_v27  ;;  %v2181_v26 = vld [vmem:[#allocation8 + $0x26c] ss:$16 sps:$4 sm:$0xff]   ;;  %v2176_v27 = vld [vmem:[#allocation8 + $0x68] ss:$16 sps:$4 sm:$0xff]  }
  0x98   :  { %1233 = vmatpush2.bf16.msra.mxu0 %v2140_v28  ;;  %1276 = vmatpush2.bf16.msra.mxu1 %v2143_v29  ;;  %v2179_v28 = vld [vmem:[#allocation8 + $0x268] ss:$16 sps:$4 sm:$0xff]   ;;  %v2184_v29 = vld [vmem:[#allocation8 + $0x4c] ss:$16 sps:$4 sm:$0xff]  }
  0x99   :  { %1234 = vmatprep.subr.bf16.mxu0 %v2148_v30  ;;  %1277 = vmatprep.subr.bf16.mxu1 %v2151_v31  ;;  %v2187_v30 = vld [vmem:[#allocation8 + $0x24c] ss:$16 sps:$4 sm:$0xff]   ;;  %v2182_v31 = vld [vmem:[#allocation8 + $0x48] ss:$16 sps:$4 sm:$0xff]  }
  0x9c   :  { %1235 = vmatpush2.bf16.msra.mxu0 %v2146_v32  ;;  %1278 = vmatpush2.bf16.msra.mxu1 %v2149_v33  ;;  %v2185_v32 = vld [vmem:[#allocation8 + $0x248] ss:$16 sps:$4 sm:$0xff]   ;;  %v2190_v33 = vld [vmem:[#allocation8 + $0x2c] ss:$16 sps:$4 sm:$0xff]  }
  0x9d   :  { %1290 = vmatprep.subr.bf16.mxu0 %v2154_v34  ;;  %1333 = vmatprep.subr.bf16.mxu1 %v2157_v35  ;;  %v2193_v34 = vld [vmem:[#allocation8 + $0x22c] ss:$16 sps:$4 sm:$0xff]   ;;  %v2188_v35 = vld [vmem:[#allocation8 + $0x28] ss:$16 sps:$4 sm:$0xff]  }
 0x11f   :  { %v350_v43 = vpop.f32.mrf.mxu0  ;;  %v393_v44 = vpop.f32.mrf.mxu1 }
 0x120   :  { %v351_v57 = vadd.f32 %v350_v43, %v133_v47  ;;  %v394_v58 = vadd.f32 %v393_v44, %v141_v48  ;;  %v2199_v43 = vld [vmem:[#allocation8 + $0x20c] ss:$16 sps:$4 sm:$0xff]   ;;  %v2194_v44 = vld [vmem:[#allocation8 + $0x8] ss:$16 sps:$4 sm:$0xff]  }
 0x121   :  { %v352_v49 = vpop.f32.mrf.mxu0  ;;  %v395_v50 = vpop.f32.mrf.mxu1 }
 0x122   :  { %v353_v53 = vadd.f32 %v352_v49, %v137_v45  ;;  %v396_v54 = vadd.f32 %v395_v50, %v145_v46  ;;  %v402_v5 = vmax.f32 %v351_v57, 0.0  ;;  %v404_v6 = vmax.f32 %v394_v58, 0.0  ;;  %v2203_v49 = vld [vmem:[#allocation8 + $0x3e8] ss:$16 sps:$4 sm:$0xff]   ;;  %v2208_v50 = vld [vmem:[#allocation8 + $0x1cc] ss:$16 sps:$4 sm:$0xff]  }
 0x123   :  { %v354_v51 = vpop.f32.mrf.mxu0  ;;  %v397_v52 = vpop.f32.mrf.mxu1  ;;  %v2215_v57 = vld [vmem:[#allocation8 + $0x3a8] ss:$16 sps:$4 sm:$0xff]   ;;  %v2220_v58 = vld [vmem:[#allocation8 + $0x18c] ss:$16 sps:$4 sm:$0xff]  }
 0x124   :  { %v355_v55 = vadd.f32 %v354_v51, %v133_v47  ;;  %v398_v56 = vadd.f32 %v397_v52, %v141_v48  ;;  %v403_v1 = vmax.f32 %v353_v53, 0.0  ;;  %v405_v2 = vmax.f32 %v396_v54, 0.0  ;;  %v2205_v47 = vld [vmem:[#allocation8 + $0x3ec] ss:$16 sps:$4 sm:$0xff]   ;;  %v2200_v48 = vld [vmem:[#allocation8 + $0x1e8] ss:$16 sps:$4 sm:$0xff]  }
 0x125   :  { %v356_v59 = vpop.f32.mrf.mxu0  ;;  %v399_v60 = vpop.f32.mrf.mxu1  ;;  %v2211_v51 = vld [vmem:[#allocation8 + $0x3cc] ss:$16 sps:$4 sm:$0xff]   ;;  %v2206_v52 = vld [vmem:[#allocation8 + $0x1c8] ss:$16 sps:$4 sm:$0xff]  }
 0x126   :  { %v357_v61 = vadd.f32 %v356_v59, %v137_v45  ;;  %v400_v62 = vadd.f32 %v399_v60, %v145_v46  ;;  %v406_v63 = vmax.f32 %v355_v55, 0.0  ;;  %v408_v0 = vmax.f32 %v398_v56, 0.0  ;;  %v2197_v45 = vld [vmem:[#allocation8 + $0x208] ss:$16 sps:$4 sm:$0xff]   ;;  %v2202_v46 = vld [vmem:[#allocation8 + $0x1ec] ss:$16 sps:$4 sm:$0xff]  }
 0x127   :  { %v2209_v53 = vld [vmem:[#allocation8 + $0x3c8] ss:$16 sps:$4 sm:$0xff]   ;;  %v2214_v54 = vld [vmem:[#allocation8 + $0x1ac] ss:$16 sps:$4 sm:$0xff]  }
 0x128   :  { %v407_v3 = vmax.f32 %v357_v61, 0.0  ;;  %v409_v4 = vmax.f32 %v400_v62, 0.0  ;;  %v2494_v11 = vpack.c.bf16 %v406_v63, %v402_v5  ;;  %v2496_v12 = vpack.c.bf16 %v408_v0, %v404_v6  ;;  %v2217_v55 = vld [vmem:[#allocation8 + $0x3ac] ss:$16 sps:$4 sm:$0xff]   ;;  %v2212_v56 = vld [vmem:[#allocation8 + $0x1a8] ss:$16 sps:$4 sm:$0xff]  }
 0x129   :  { %v2223_v59 = vld [vmem:[#allocation8 + $0x38c] ss:$16 sps:$4 sm:$0xff]   ;;  %v2218_v60 = vld [vmem:[#allocation8 + $0x188] ss:$16 sps:$4 sm:$0xff]  }
 0x12a   :  { %v411_v7 = vpack.c.bf16 %v407_v3, %v403_v1  ;;  %v413_v8 = vpack.c.bf16 %v409_v4, %v405_v2  ;;  %v2221_v61 = vld [vmem:[#allocation8 + $0x388] ss:$16 sps:$4 sm:$0xff]   ;;  %v2226_v62 = vld [vmem:[#allocation8 + $0x16c] ss:$16 sps:$4 sm:$0xff]  }
 0x12b   :  { %v2229_v63 = vld [vmem:[#allocation8 + $0x36c] ss:$16 sps:$4 sm:$0xff]   ;;  %v2224_v0 = vld [vmem:[#allocation8 + $0x168] ss:$16 sps:$4 sm:$0xff]  }
 0x12c   :  { %1236 = vmatprep.mubr.bf16.mxu0 %v411_v7  ;;  %1279 = vmatprep.mubr.bf16.mxu1 %v413_v8  ;;  %v2227_v1 = vld [vmem:[#allocation8 + $0x368] ss:$16 sps:$4 sm:$0xff]   ;;  %v2232_v2 = vld [vmem:[#allocation8 + $0x14c] ss:$16 sps:$4 sm:$0xff]  }
 0x12d   :  { %1237 = vmatmul.mubr.bf16.vlgmr.msra.gmra.mxu0 %v2494_v11  ;;  %1280 = vmatmul.mubr.bf16.vlgmr.msra.gmra.mxu1 %v2496_v12  ;;  %v2235_v3 = vld [vmem:[#allocation8 + $0x34c] ss:$16 sps:$4 sm:$0xff]   ;;  %v2230_v4 = vld [vmem:[#allocation8 + $0x148] ss:$16 sps:$4 sm:$0xff]  }
 0x12e   :  { %1291 = vmatpush1.bf16.msra.mxu0 %v2152_v9  ;;  %1334 = vmatpush1.bf16.msra.mxu1 %v2155_v10  ;;  %v2233_v5 = vld [vmem:[#allocation8 + $0x348] ss:$16 sps:$4 sm:$0xff]   ;;  %v2238_v6 = vld [vmem:[#allocation8 + $0x12c] ss:$16 sps:$4 sm:$0xff]  }
 0x12f   :  { %1322 = vmatprep.mubr.bf16.mxu0 %v411_v7  ;;  %1365 = vmatprep.mubr.bf16.mxu1 %v413_v8  ;;  %v2241_v7 = vld [vmem:[#allocation8 + $0x32c] ss:$16 sps:$4 sm:$0xff]   ;;  %v2236_v8 = vld [vmem:[#allocation8 + $0x128] ss:$16 sps:$4 sm:$0xff]  }
 0x130   :  { %1292 = vmatprep.subr.bf16.mxu0 %v2160_v13  ;;  %1335 = vmatprep.subr.bf16.mxu1 %v2163_v14  ;;  %v2239_v9 = vld [vmem:[#allocation8 + $0x328] ss:$16 sps:$4 sm:$0xff]   ;;  %v2244_v10 = vld [vmem:[#allocation8 + $0x10c] ss:$16 sps:$4 sm:$0xff]  }
 0x131   :  { %v2247_v13 = vld [vmem:[#allocation8 + $0x30c] ss:$16 sps:$4 sm:$0xff]   ;;  %v2242_v14 = vld [vmem:[#allocation8 + $0x108] ss:$16 sps:$4 sm:$0xff]  }
 0x132   :  { %1293 = vmatpush1.bf16.msra.mxu0 %v2158_v15  ;;  %1336 = vmatpush1.bf16.msra.mxu1 %v2161_v16  ;;  %v2245_v15 = vld [vmem:[#allocation8 + $0x308] ss:$16 sps:$4 sm:$0xff]  }
 0x133   :  { %1294 = vmatprep.subr.bf16.mxu0 %v2166_v17  ;;  %1337 = vmatprep.subr.bf16.mxu1 %v2169_v18  ;;  %v2248_v16 = vld [vmem:[#allocation10 + $0x78] sm:$0xff]   ;;  %v2250_v18 = vld [vmem:[#allocation10 + $0x70] sm:$0xff]  }
 0x134   :  { %v2249_v17 = vld [vmem:[#allocation10 + $0x38] sm:$0xff]  }
 0x136   :  { %1295 = vmatpush1.bf16.msra.mxu0 %v2164_v19  ;;  %1338 = vmatpush1.bf16.msra.mxu1 %v2167_v20  ;;  %v2251_v19 = vld [vmem:[#allocation10 + $0x30] sm:$0xff]   ;;  %v2252_v20 = vld [vmem:[#allocation10 + $0x68] sm:$0xff]  }
 0x137   :  { %1296 = vmatprep.subr.bf16.mxu0 %v2172_v21  ;;  %1339 = vmatprep.subr.bf16.mxu1 %v2175_v22  ;;  %v2253_v21 = vld [vmem:[#allocation10 + $0x28] sm:$0xff]   ;;  %v2254_v22 = vld [vmem:[#allocation10 + $0x60] sm:$0xff]  }
 0x13a   :  { %1297 = vmatpush1.bf16.msra.mxu0 %v2170_v23  ;;  %1340 = vmatpush1.bf16.msra.mxu1 %v2173_v24  ;;  %v2255_v23 = vld [vmem:[#allocation10 + $0x20] sm:$0xff]   ;;  %v2256_v24 = vld [vmem:[#allocation10 + $0x58] sm:$0xff]  }
 0x13b   :  { %1298 = vmatprep.subr.bf16.mxu0 %v2178_v25  ;;  %1341 = vmatprep.subr.bf16.mxu1 %v2181_v26  ;;  %v2257_v25 = vld [vmem:[#allocation10 + $0x18] sm:$0xff]   ;;  %v2258_v26 = vld [vmem:[#allocation10 + $0x50] sm:$0xff]  }
 0x13e   :  { %1299 = vmatpush1.bf16.msra.mxu0 %v2176_v27  ;;  %1342 = vmatpush1.bf16.msra.mxu1 %v2179_v28  ;;  %v2264_v27 = vld [vmem:[#allocation10 + $0xf8] sm:$0xff]   ;;  %v2266_v28 = vld [vmem:[#allocation10 + $0xf0] sm:$0xff]  }
 0x13f   :  { %1300 = vmatprep.subr.bf16.mxu0 %v2184_v29  ;;  %1343 = vmatprep.subr.bf16.mxu1 %v2187_v30  ;;  %v2260_v29 = vld [vmem:[#allocation10 + $0x48] sm:$0xff]   ;;  %v2267_v30 = vld [vmem:[#allocation10 + $0xb0] sm:$0xff]  }
 0x142   :  { %1301 = vmatpush1.bf16.msra.mxu0 %v2182_v31  ;;  %1344 = vmatpush1.bf16.msra.mxu1 %v2185_v32  ;;  %v2268_v31 = vld [vmem:[#allocation10 + $0xe8] sm:$0xff]  }
 0x143   :  { %1302 = vmatprep.subr.bf16.mxu0 %v2190_v33  ;;  %1345 = vmatprep.subr.bf16.mxu1 %v2193_v34  ;;  %v2261_v32 = vld [vmem:[#allocation10 + $0x8] sm:$0xff]   ;;  %v2262_v33 = vld [vmem:[#allocation10 + $0x40] sm:$0xff]  }
 0x144   :  { %v2269_v34 = vld [vmem:[#allocation10 + $0xa8] sm:$0xff]  }
 0x146   :  { %1303 = vmatpush1.bf16.msra.mxu0 %v2188_v35  ;;  %1346 = vmatpush1.bf16.msra.mxu1 %v2191_v36  ;;  %v2270_v35 = vld [vmem:[#allocation10 + $0xe0] sm:$0xff]  }
 0x147   :  { %1304 = vmatprep.subr.bf16.mxu0 %v2196_v42  ;;  %1347 = vmatprep.subr.bf16.mxu1 %v2199_v43  ;;  %v2263_v36 = vld [vmem:[#allocation10] sm:$0xff]   ;;  %v2272_v43 = vld [vmem:[#allocation10 + $0xd8] sm:$0xff]  }
 0x148   :  { %v2271_v42 = vld [vmem:[#allocation10 + $0xa0] sm:$0xff]  }
 0x14a   :  { %1305 = vmatpush1.bf16.msra.mxu0 %v2194_v44  ;;  %1348 = vmatpush1.bf16.msra.mxu1 %v2197_v45  ;;  %v2273_v44 = vld [vmem:[#allocation10 + $0x98] sm:$0xff]   ;;  %v2274_v45 = vld [vmem:[#allocation10 + $0xd0] sm:$0xff]  }
 0x14b   :  { %1306 = vmatprep.subr.bf16.mxu0 %v2202_v46  ;;  %1349 = vmatprep.subr.bf16.mxu1 %v2205_v47  ;;  %v2275_v46 = vld [vmem:[#allocation10 + $0x90] sm:$0xff]   ;;  %v2276_v47 = vld [vmem:[#allocation10 + $0xc8] sm:$0xff]  }
 0x14e   :  { %1307 = vmatpush2.bf16.msra.mxu0 %v2200_v48  ;;  %1350 = vmatpush2.bf16.msra.mxu1 %v2203_v49  ;;  %v2277_v48 = vld [vmem:[#allocation10 + $0x88] sm:$0xff]   ;;  %v2278_v49 = vld [vmem:[#allocation10 + $0xc0] sm:$0xff]  }
 0x14f   :  { %1308 = vmatprep.subr.bf16.mxu0 %v2208_v50  ;;  %1351 = vmatprep.subr.bf16.mxu1 %v2211_v51  ;;  %v2279_v50 = vld [vmem:[#allocation10 + $0x80] sm:$0xff]   ;;  %v542_v51 = vld [vmem:[%s2523_s4] sm:$0xf] }
 0x152   :  { %1309 = vmatpush2.bf16.msra.mxu0 %v2206_v52  ;;  %1352 = vmatpush2.bf16.msra.mxu1 %v2209_v53  ;;  %v551_v52 = vrot.slane %v542_v51, %v136_v38  ;;  %v547_v53 = vrot.slane %v542_v51, %v132_v40 }
 0x153   :  { %1310 = vmatprep.subr.bf16.mxu0 %v2214_v54  ;;  %1353 = vmatprep.subr.bf16.mxu1 %v2217_v55 }
 0x156   :  { %1311 = vmatpush2.bf16.msra.mxu0 %v2212_v56  ;;  %1354 = vmatpush2.bf16.msra.mxu1 %v2215_v57 }
 0x157   :  { %1312 = vmatprep.subr.bf16.mxu0 %v2220_v58  ;;  %1355 = vmatprep.subr.bf16.mxu1 %v2223_v59 }
 0x15a   :  { %1313 = vmatpush2.bf16.msra.mxu0 %v2218_v60  ;;  %1356 = vmatpush2.bf16.msra.mxu1 %v2221_v61 }
 0x15b   :  { %1314 = vmatprep.subr.bf16.mxu0 %v2226_v62  ;;  %1357 = vmatprep.subr.bf16.mxu1 %v2229_v63 }
 0x15e   :  { %1315 = vmatpush2.bf16.msra.mxu0 %v2224_v0  ;;  %1358 = vmatpush2.bf16.msra.mxu1 %v2227_v1 }
 0x15f   :  { %1316 = vmatprep.subr.bf16.mxu0 %v2232_v2  ;;  %1359 = vmatprep.subr.bf16.mxu1 %v2235_v3 }
 0x162   :  { %1317 = vmatpush2.bf16.msra.mxu0 %v2230_v4  ;;  %1360 = vmatpush2.bf16.msra.mxu1 %v2233_v5 }
 0x163   :  { %1318 = vmatprep.subr.bf16.mxu0 %v2238_v6  ;;  %1361 = vmatprep.subr.bf16.mxu1 %v2241_v7 }
 0x166   :  { %1319 = vmatpush2.bf16.msra.mxu0 %v2236_v8  ;;  %1362 = vmatpush2.bf16.msra.mxu1 %v2239_v9 }
 0x167   :  { %1320 = vmatprep.subr.bf16.mxu0 %v2244_v10  ;;  %1363 = vmatprep.subr.bf16.mxu1 %v2247_v13  ;;  %v559_v10 = vrot.slane %v542_v51, %v144_v39  ;;  %v555_v13 = vrot.slane %v542_v51, %v140_v41 }
 0x16a   :  { %1321 = vmatpush2.bf16.msra.mxu0 %v2242_v14  ;;  %1364 = vmatpush2.bf16.msra.mxu1 %v2245_v15 }
 0x16b   :  { %1950 = vmatprep.subr.bf16.mxu0 %v2248_v16  ;;  %1972 = vmatprep.subr.bf16.mxu1 %v2264_v27 }
 0x16d   :  { %1323 = vmatmul.mubr.bf16.vlgmr.msra.gmra.mxu0 %v2494_v11  ;;  %1366 = vmatmul.mubr.bf16.vlgmr.msra.gmra.mxu1 %v2496_v12  ;;  %v2265_v11 = vld [vmem:[#allocation10 + $0xb8] sm:$0xff]   ;;  %v2259_v12 = vld [vmem:[#allocation10 + $0x10] sm:$0xff]  }
 0x16e   :  { %1951 = vmatpush3.bf16.msra.mxu0 %v2249_v17  ;;  %1973 = vmatpush3.bf16.msra.mxu1 %v2265_v11 }
 0x16f   :  { %1952 = vmatprep.subr.bf16.mxu0 %v2250_v18  ;;  %1974 = vmatprep.subr.bf16.mxu1 %v2266_v28 }
 0x172   :  { %1953 = vmatpush3.bf16.msra.mxu0 %v2251_v19  ;;  %1975 = vmatpush3.bf16.msra.mxu1 %v2267_v30 }
 0x173   :  { %1954 = vmatprep.subr.bf16.mxu0 %v2252_v20  ;;  %1976 = vmatprep.subr.bf16.mxu1 %v2268_v31 }
 0x176   :  { %1955 = vmatpush3.bf16.msra.mxu0 %v2253_v21  ;;  %1977 = vmatpush3.bf16.msra.mxu1 %v2269_v34 }
 0x177   :  { %1956 = vmatprep.subr.bf16.mxu0 %v2254_v22  ;;  %1978 = vmatprep.subr.bf16.mxu1 %v2270_v35  ;;  %v1917_v35 = vld [vmem:[%s2525_s6] ss:$0 sm:$0xff]  ;;  %s2384_s6 = scalar_lea.vmem %s1743_s29, 256 }
 0x178   :  { %p2385_p11 = scmp.ne.s32.totalorder %s1743_s29, %s2384_s6  ;;  %p2390_p13 = scmp.lt.s32.totalorder %s2384_s6, %s2384_s6 }
 0x17a   :  { %1957 = vmatpush3.bf16.msra.mxu0 %v2255_v23  ;;  %1979 = vmatpush3.bf16.msra.mxu1 %v2271_v42  ;;  %p2391_p0 = por %p2390_p13, %p2389_p12 }
 0x17b   :  { %1958 = vmatprep.subr.bf16.mxu0 %v2256_v24  ;;  %1980 = vmatprep.subr.bf16.mxu1 %v2272_v43 }
 0x17c   :  { %p2392_p1 = pnand %p2391_p0, %p2385_p11 }
 0x17e   :  { %1959 = vmatpush3.bf16.msra.mxu0 %v2257_v25  ;;  %1981 = vmatpush3.bf16.msra.mxu1 %v2273_v44 }
 0x17f   :  { %1960 = vmatprep.subr.bf16.mxu0 %v2258_v26  ;;  %1982 = vmatprep.subr.bf16.mxu1 %v2274_v45 }
 0x182   :  { %1961 = vmatpush3.bf16.msra.mxu0 %v2259_v12  ;;  %1983 = vmatpush3.bf16.msra.mxu1 %v2275_v46 }
 0x183   :  { %1962 = vmatprep.subr.bf16.mxu0 %v2260_v29  ;;  %1984 = vmatprep.subr.bf16.mxu1 %v2276_v47 }
 0x186   :  { %1963 = vmatpush3.bf16.msra.mxu0 %v2261_v32  ;;  %1985 = vmatpush3.bf16.msra.mxu1 %v2277_v48 }
 0x187   :  { %1964 = vmatprep.subr.bf16.mxu0 %v2262_v33  ;;  %1986 = vmatprep.subr.bf16.mxu1 %v2278_v49 }
 0x18a   :  { %1965 = vmatpush3.bf16.msra.mxu0 %v2263_v36  ;;  %1987 = vmatpush3.bf16.msra.mxu1 %v2279_v50 }
 0x1ed   :  { %v1238_v54 = vpop.f32.mrf.mxu0  ;;  %v1281_v55 = vpop.f32.mrf.mxu1 }
 0x1ee   :  { %v1239_v59 = vadd.f32 %v1238_v54, %v547_v53 }
 0x1ef   :  { %v1240_v56 = vpop.f32.mrf.mxu0  ;;  %v1283_v57 = vpop.f32.mrf.mxu1 }
 0x1f0   :  { %v1241_v58 = vadd.f32 %v1240_v56, %v551_v52  ;;  %v1282_v3 = vadd.f32 %v1281_v55, %v1239_v59 }
 0x1f1   :  { %v1242_v60 = vpop.f32.mrf.mxu0  ;;  %v1285_v61 = vpop.f32.mrf.mxu1 }
 0x1f2   :  { %v1243_v62 = vadd.f32 %v1242_v60, %v547_v53  ;;  %v1284_v0 = vadd.f32 %v1283_v57, %v1241_v58  ;;  %v1376_v40 = vmax.f32 %v1282_v3, 0.0 }
 0x1f3   :  { %v1244_v63 = vpop.f32.mrf.mxu0  ;;  %v1287_v4 = vpop.f32.mrf.mxu1 }
 0x1f4   :  { %v1286_v1 = vadd.f32 %v1285_v61, %v1243_v62  ;;  %v1245_v2 = vadd.f32 %v1244_v63, %v551_v52  ;;  %v1377_v6 = vmax.f32 %v1284_v0, 0.0 }
 0x1f6   :  { %v1288_v5 = vadd.f32 %v1287_v4, %v1245_v2  ;;  %v1380_v38 = vmax.f32 %v1286_v1, 0.0 }
 0x1f8   :  { %v1381_v7 = vmax.f32 %v1288_v5, 0.0  ;;  %v1384_v9 = vpack.c.bf16 %v1380_v38, %v1376_v40 }
 0x1fa   :  { %v1385_v8 = vpack.c.bf16 %v1381_v7, %v1377_v6 }
 0x1fc   :  { %1683 = vmatprep.mubr.bf16.mxu0 %v1385_v8 }
 0x1fd   :  { %1684 = vmatmul.mubr.bf16.vlgmr.msra.gmra.mxu0 %v1384_v9 }
 0x22d   :  { %v1324_v14 = vpop.f32.mrf.mxu0  ;;  %v1367_v15 = vpop.f32.mrf.mxu1 }
 0x22e   :  { %v1325_v19 = vadd.f32 %v1324_v14, %v555_v13 }
 0x22f   :  { %v1326_v16 = vpop.f32.mrf.mxu0  ;;  %v1369_v17 = vpop.f32.mrf.mxu1 }
 0x230   :  { %v1327_v18 = vadd.f32 %v1326_v16, %v559_v10  ;;  %v1368_v27 = vadd.f32 %v1367_v15, %v1325_v19 }
 0x231   :  { %v1328_v20 = vpop.f32.mrf.mxu0  ;;  %v1371_v21 = vpop.f32.mrf.mxu1 }
 0x232   :  { %v1329_v22 = vadd.f32 %v1328_v20, %v555_v13  ;;  %v1370_v24 = vadd.f32 %v1369_v17, %v1327_v18  ;;  %v1378_v41 = vmax.f32 %v1368_v27, 0.0 }
 0x233   :  { %v1330_v23 = vpop.f32.mrf.mxu0  ;;  %v1373_v11 = vpop.f32.mrf.mxu1 }
 0x234   :  { %v1372_v25 = vadd.f32 %v1371_v21, %v1329_v22  ;;  %v1331_v26 = vadd.f32 %v1330_v23, %v559_v10  ;;  %v1379_v12 = vmax.f32 %v1370_v24, 0.0 }
 0x236   :  { %v1374_v28 = vadd.f32 %v1373_v11, %v1331_v26  ;;  %v1382_v39 = vmax.f32 %v1372_v25, 0.0 }
 0x238   :  { %v1383_v37 = vmax.f32 %v1374_v28, 0.0  ;;  %v1386_v30 = vpack.c.bf16 %v1382_v39, %v1378_v41 }
 0x23a   :  { %v1387_v29 = vpack.c.bf16 %v1383_v37, %v1379_v12 }
 0x23c   :  { %1724 = vmatprep.mubr.bf16.mxu1 %v1387_v29 }
 0x23d   :  { %1725 = vmatmul.mubr.bf16.vlgmr.msra.gmra.mxu1 %v1386_v30 }
 0x2bd   :  { %v1966_v31 = vpop.f32.mrf.mxu0 }
 0x2bf   :  { %v1967_v32 = vpop.f32.mrf.mxu0 }
 0x2c0   :  { %v1968_v34 = vadd.f32 %v1967_v32, %v1966_v31 }
 0x2c1   :  { %v1969_v33 = vpop.f32.mrf.mxu0 }
 0x2c2   :  { %v1686_v44 = vadd.f32 %v1968_v34, %v1917_v35 }
 0x2c3   :  { %v1970_v36 = vpop.f32.mrf.mxu0 }
 0x2c4   :  { %v1971_v45 = vadd.f32 %v1970_v36, %v1969_v33 }
 0x2c6   :  { %v1689_v50 = vadd.f32 %v1971_v45, %v1917_v35 }
 0x2fd   :  { %v1988_v42 = vpop.f32.mrf.mxu1 }
 0x2ff   :  { %v1989_v43 = vpop.f32.mrf.mxu1 }
 0x300   :  { %v1990_v46 = vadd.f32 %v1989_v43, %v1988_v42 }
 0x301   :  { %v1991_v47 = vpop.f32.mrf.mxu1 }
 0x302   :  { %v1727_v48 = vadd.f32 %v1990_v46, %v1686_v44 }
 0x303   :  { %v1992_v49 = vpop.f32.mrf.mxu1 }
 0x304   :  { %2280 = vtanh.f32 %v1727_v48  ;;  %v1993_v51 = vadd.f32 %v1992_v49, %v1991_v47 }
 0x306   :  { %v1730_v52 = vadd.f32 %v1993_v51, %v1689_v50 }
 0x308   :  { %2282 = vtanh.f32 %v1730_v52 }
 0x311   :  { %v2281_v53 = vpop.eup %2280 }
 0x312   :  { %1735 = vst [vmem:[#allocation11] sm:$0xff] %v2281_v53 }
 0x315   :  { %v2283_v54 = vpop.eup %2282 }
 0x316   :  { %1736 = vst [vmem:[#allocation11 + $0x8] sm:$0xff] %v2283_v54 }
 0x317   :  { %2395 = shalt.err (!%p2392_p1)
}
 0x318   :  { %s2423_s30 = smov 128   ;;  %s2424_s8 = smov 8  }
 0x319   :  { %1748 = dma.vmem_to_hbm [thread:$0]  %s1743_s29, 256, %s2526_s7, [#allocation4], %s2423_s30, %s2423_s30, %s2424_s8  }
 0x31a   :  { %2410 = dma.done.wait [#allocation4], 256  }
 0x31b   :  { %2411 = vsyncadd [#allocation4], 4294967040 }
 0x31c   :  { %1752 = vsyncpa [#allocation3], 1 }
 0x31d   :  { %1753 = vsyncpa [#allocation6], 1 }
 0x31e   :  { %1754 = vsyncpa [#allocation9], 1 }
 0x31f   :  { %1755 = vsyncpa [#allocation4], 1 }

</bundles_post_ra>
